<compile_context>
chip_gen: v5e
topology: v5e:2x2
jax: 0.10.0
libtpu: 0.0.40
codegen_flags: <defaults>
</compile_context>

<pallas_src>
import functools

import jax
import jax.numpy as jnp
from jax.experimental import pallas as pl
from jax.experimental.pallas import tpu as pltpu


# ----------------------------- fused kernel --------------------------------

def _fused_attention_kernel(x_ref, wqkv_ref, rel_ref, wout_ref, bout_ref,
                            o_ref, *, heads, dim_head, scale, compat):
    n = x_ref.shape[1]
    inner = heads * dim_head

    # single fused q/k/v projection on the MXU (bf16 operands, f32 acc)
    x = x_ref[0].astype(jnp.bfloat16)                       # (n, dim)
    qkv = jnp.dot(x, wqkv_ref[...],
                  preferred_element_type=jnp.float32)       # (n, 3*inner) f32

    # scale folded into q once (applies to both content and rel-pos logits)
    q = (qkv[:, :inner] * scale).astype(jnp.bfloat16)
    k = qkv[:, inner:2 * inner].astype(jnp.bfloat16)
    v = qkv[:, 2 * inner:].astype(jnp.bfloat16)

    if compat:
        # TODO(synk): fallback only -- per-head slices reintroduce VMEM copies.
        def _split(t):
            return jnp.stack(
                [t[:, hh * dim_head:(hh + 1) * dim_head] for hh in range(heads)],
                axis=0)
        qh, kh, vh = _split(q), _split(k), _split(v)
    else:
        # layout-aware head split: (n, h*d) -> (h, n, d), no per-head slices
        qh = pltpu.einshape("n(hd)->hnd", q, h=heads, d=dim_head)
        kh = pltpu.einshape("n(hd)->hnd", k, h=heads, d=dim_head)
        vh = pltpu.einshape("n(hd)->hnd", v, h=heads, d=dim_head)

    # content logits: one batched MXU matmul over heads
    dots = jnp.einsum("hid,hjd->hij", qh, kh,
                      preferred_element_type=jnp.float32)   # (h, n, n)

    # relative-position logits via the skew trick:
    #   P[h, i, c] = q[h, i] . rel_used[c],   rel_used[c] = emb[clip((n-1)-c)]
    #   pos[h, i, j] = P[h, i, (n-1) - i + j]
    rel = rel_ref[...]                                      # (2n-1, d) bf16
    rel_b = jnp.broadcast_to(rel, (heads,) + rel.shape)     # (h, 2n-1, d)
    p_all = jnp.einsum("hid,hrd->hir", qh, rel_b,
                       preferred_element_type=jnp.float32)  # (h, n, 2n-1)
    pos = jnp.concatenate(
        [p_all[:, i:i + 1, (n - 1) - i:(2 * n - 1) - i] for i in range(n)],
        axis=1)                                             # (h, n, n)

    logits = dots + pos

    # numerically-stable softmax in f32; reciprocal goes to the EUP slot
    m = jnp.max(logits, axis=-1, keepdims=True)
    e = jnp.exp(logits - m)
    den = jnp.sum(e, axis=-1, keepdims=True)
    attn = (e * pl.reciprocal(den, approx=True)).astype(jnp.bfloat16)

    ctx = jnp.einsum("hij,hjd->hid", attn, vh,
                     preferred_element_type=jnp.float32)    # (h, n, d)
    ctx = ctx.astype(jnp.bfloat16)

    if compat:
        merged = jnp.concatenate([ctx[hh] for hh in range(heads)], axis=-1)
    else:
        # layout-aware head merge: (h, n, d) -> (n, h*d), lane-dense operand
        merged = pltpu.einshape("hnd->n(hd)", ctx)          # (n, inner)

    # output projection (bf16 MXU) + f32 bias
    y = jnp.dot(merged, wout_ref[...], preferred_element_type=jnp.float32)
    y = y + bout_ref[...]
    o_ref[0] = y.astype(o_ref.dtype)


# --------------------------- VMEM budget helper ------------------------------

def _vmem_limit_bytes(n, dim, heads, dim_head):
    inner = heads * dim_head
    r = 2 * n - 1
    f32, bf16 = 4, 2
    io = 2 * (n * dim * f32) * 2                       # x + out blocks, 2 bufs
    weights = (2 * (dim * 3 * inner + inner * dim + r * dim_head) * bf16
               + 2 * dim * f32)                        # worst case 2 bufs each
    interm = f32 * (n * 3 * inner                      # qkv
                    + heads * n * r                    # q @ rel^T
                    + 4 * heads * n * n                # dots, pos, exp, attn
                    + heads * n * dim_head             # ctx
                    + n * inner + n * dim)             # merged, y
    est = io + weights + interm
    return int(min(64 * 1024 * 1024, max(2 * est + (8 << 20), 16 << 20)))


# ------------------------------ full forward --------------------------------

def attention_forward(x, params, heads, dim_head, max_pos_emb, compat=False):
    b, n, dim = x.shape
    inner = heads * dim_head
    scale = dim_head ** (-0.5)

    # one-time wrapper glue: fused qkv weight + bf16 weight/rel shipping
    wqkv = jnp.concatenate([params["wq_t"], params["wkv_t"]],
                           axis=1).astype(jnp.bfloat16)          # (dim, 3*inner)
    wout = params["wout_t"].astype(jnp.bfloat16)                 # (inner, dim)
    bout2 = params["bout"].reshape(1, dim).astype(jnp.float32)

    # skew table: rel_used[c] = rel_emb[clip((n-1) - c, -L, L) + L], O(n*d)
    c = jnp.arange(2 * n - 1)
    rel_idx = jnp.clip((n - 1) - c, -max_pos_emb, max_pos_emb) + max_pos_emb
    rel_used = jnp.take(params["rel_emb"], rel_idx,
                        axis=0).astype(jnp.bfloat16)             # (2n-1, d)

    kernel = functools.partial(_fused_attention_kernel, heads=heads,
                               dim_head=dim_head, scale=scale, compat=compat)

    def const_spec(shape):
        nd = len(shape)
        imap = lambda i, _nd=nd: (0,) * _nd
        if compat:
            return pl.BlockSpec(shape, imap)
        # grid-invariant block: single-buffer (no pipelining benefit)
        return pl.BlockSpec(shape, imap, pipeline_mode=pl.Buffered(1))

    r = 2 * n - 1
    flops = b * (2 * n * dim * 3 * inner                 # qkv projection
                 + 2 * heads * n * n * dim_head          # content logits
                 + 2 * heads * n * r * dim_head          # rel-pos logits
                 + 2 * heads * n * n * dim_head          # attn @ v
                 + 2 * n * inner * dim)                  # output projection
    bytes_accessed = (4 * x.size + 2 * wqkv.size + 2 * rel_used.size
                      + 2 * wout.size + 4 * dim + 4 * b * n * dim)
    cost = pl.CostEstimate(flops=int(flops),
                           transcendentals=int(b * heads * n * n),
                           bytes_accessed=int(bytes_accessed))

    out = pl.pallas_call(
        kernel,
        out_shape=jax.ShapeDtypeStruct((b, n, dim), x.dtype),
        grid=(b,),
        in_specs=[
            pl.BlockSpec((1, n, dim), lambda i: (i, 0, 0)),
            const_spec((dim, 3 * inner)),
            const_spec((r, dim_head)),
            const_spec((inner, dim)),
            const_spec((1, dim)),
        ],
        out_specs=pl.BlockSpec((1, n, dim), lambda i: (i, 0, 0)),
        compiler_params=pltpu.CompilerParams(
            dimension_semantics=("parallel",),
            vmem_limit_bytes=_vmem_limit_bytes(n, dim, heads, dim_head)),
        cost_estimate=cost,
    )(x, wqkv, rel_used, wout, bout2)
    return out


# ------------------------------- reference ----------------------------------

def reference_forward(x, params, heads, dim_head, max_pos_emb):
    b, n, dim = x.shape
    inner = heads * dim_head
    scale = dim_head ** (-0.5)
    q = x @ params["wq_t"]
    kv = x @ params["wkv_t"]
    k, v = kv[..., :inner], kv[..., inner:]

    def sh(t):
        return t.reshape(b, n, heads, dim_head).transpose(0, 2, 1, 3)

    qh, kh, vh = sh(q), sh(k), sh(v)
    dots = jnp.einsum("bhid,bhjd->bhij", qh, kh) * scale
    seq = jnp.arange(n)
    dist = jnp.clip(seq[:, None] - seq[None, :],
                    -max_pos_emb, max_pos_emb) + max_pos_emb
    rel = params["rel_emb"][dist]
    pos = jnp.einsum("bhnd,nrd->bhnr", qh, rel) * scale
    attn = jax.nn.softmax(dots + pos, axis=-1)
    out = jnp.einsum("bhij,bhjd->bhid", attn, vh)
    out = out.transpose(0, 2, 1, 3).reshape(b, n, inner)
    return out @ params["wout_t"] + params["bout"]


# --------------------------------- main --------------------------------------

if __name__ == "__main__":
    b, n, dim = 2, 8, 32
    heads, dim_head, max_pos_emb = 4, 16, 16
    inner = heads * dim_head

    key = jax.random.PRNGKey(0)
    k1, k2, k3, k4, k5, k6 = jax.random.split(key, 6)
    x = jax.random.normal(k1, (b, n, dim), jnp.float32)
    params = {
        # weights stored pre-transposed (in_features, out_features)
        "wq_t": 0.05 * jax.random.normal(k2, (dim, inner), jnp.float32),
        "wkv_t": 0.05 * jax.random.normal(k3, (dim, 2 * inner), jnp.float32),
        "wout_t": 0.05 * jax.random.normal(k4, (inner, dim), jnp.float32),
        "bout": 0.05 * jax.random.normal(k5, (dim,), jnp.float32),
        "rel_emb": 0.05 * jax.random.normal(
            k6, (2 * max_pos_emb + 1, dim_head), jnp.float32),
    }

    try:
        out = jax.block_until_ready(
            attention_forward(x, params, heads, dim_head, max_pos_emb))
    except Exception:
        # Compatibility fallback: slice-based head split/merge and default
        # double-buffering, used only if pltpu.einshape grouped equations or
        # pl.Buffered(1) are unavailable in the installed jax version.
        out = jax.block_until_ready(
            attention_forward(x, params, heads, dim_head, max_pos_emb,
                              compat=True))

    ref = reference_forward(x, params, heads, dim_head, max_pos_emb)
    assert out.shape == (b, n, dim)
    # bf16 MXU operands + approx reciprocal vs. an all-f32 reference.
    assert jnp.allclose(out, ref, rtol=2e-2, atol=2e-2), "mismatch vs reference"
    print("KERNEL_OK")
</pallas_src>

<mosaic_0001>
module attributes {stable_mosaic.version = 11 : i64} {
  func.func @_fused_attention_kernel(%arg0: i32, %arg1: memref<1x8x32xf32, #tpu.memory_space<vmem>>, %arg2: memref<32x192xbf16, #tpu.memory_space<vmem>>, %arg3: memref<15x16xbf16, #tpu.memory_space<vmem>>, %arg4: memref<64x32xbf16, #tpu.memory_space<vmem>>, %arg5: memref<1x32xf32, #tpu.memory_space<vmem>>, %arg6: memref<1x8x32xf32, #tpu.memory_space<vmem>>) attributes {dimension_semantics = [#tpu.dimension_semantics<parallel>], iteration_bounds = array<i64: 2>, scalar_prefetch = 0 : i64, scratch_operands = 0 : i64, tpu.core_type = #tpu.core_type<tc>, window_params = [{transform_indices = @transform_0, window_bounds = array<i64: 1, 8, 32>}, {pipeline_mode = #tpu.pipeline_mode<synchronous>, transform_indices = @transform_1, window_bounds = array<i64: 32, 192>}, {pipeline_mode = #tpu.pipeline_mode<synchronous>, transform_indices = @transform_2, window_bounds = array<i64: 15, 16>}, {pipeline_mode = #tpu.pipeline_mode<synchronous>, transform_indices = @transform_3, window_bounds = array<i64: 64, 32>}, {pipeline_mode = #tpu.pipeline_mode<synchronous>, transform_indices = @transform_4, window_bounds = array<i64: 1, 32>}, {transform_indices = @transform_5, window_bounds = array<i64: 1, 8, 32>}]} {
    %c0 = arith.constant 0 : index
    %c0_0 = arith.constant 0 : index
    %c0_1 = arith.constant 0 : index
    %0 = vector.load %arg1[%c0, %c0_0, %c0_1] : memref<1x8x32xf32, #tpu.memory_space<vmem>>, vector<1x8x32xf32>
    %1 = vector.shape_cast %0 : vector<1x8x32xf32> to vector<8x32xf32>
    %2 = arith.truncf %1 : vector<8x32xf32> to vector<8x32xbf16>
    %c0_2 = arith.constant 0 : index
    %c0_3 = arith.constant 0 : index
    %3 = vector.load %arg2[%c0_2, %c0_3] : memref<32x192xbf16, #tpu.memory_space<vmem>>, vector<32x192xbf16>
    %cst = arith.constant dense<0.000000e+00> : vector<8x192xf32>
    %4 = tpu.matmul %2, %3, %cst {dimension_numbers = #tpu.dot_dimension_numbers<[1], [0], [0], [1], [0, 0, 1, 1], [], []>} : vector<8x32xbf16>, vector<32x192xbf16>, vector<8x192xf32> -> vector<8x192xf32>
    %5 = vector.extract_strided_slice %4 {offsets = [0, 0], sizes = [8, 64], strides = [1, 1]} : vector<8x192xf32> to vector<8x64xf32>
    %cst_4 = arith.constant 2.500000e-01 : f32
    %6 = vector.broadcast %cst_4 : f32 to vector<8x64xf32>
    %7 = arith.mulf %5, %6 : vector<8x64xf32>
    %8 = arith.truncf %7 : vector<8x64xf32> to vector<8x64xbf16>
    %9 = vector.extract_strided_slice %4 {offsets = [0, 64], sizes = [8, 64], strides = [1, 1]} : vector<8x192xf32> to vector<8x64xf32>
    %10 = arith.truncf %9 : vector<8x64xf32> to vector<8x64xbf16>
    %11 = vector.extract_strided_slice %4 {offsets = [0, 128], sizes = [8, 64], strides = [1, 1]} : vector<8x192xf32> to vector<8x64xf32>
    %12 = arith.truncf %11 : vector<8x64xf32> to vector<8x64xbf16>
    %13 = vector.extract_strided_slice %8 {offsets = [0, 0], sizes = [8, 16], strides = [1, 1]} : vector<8x64xbf16> to vector<8x16xbf16>
    %14 = vector.extract_strided_slice %8 {offsets = [0, 16], sizes = [8, 16], strides = [1, 1]} : vector<8x64xbf16> to vector<8x16xbf16>
    %15 = vector.extract_strided_slice %8 {offsets = [0, 32], sizes = [8, 16], strides = [1, 1]} : vector<8x64xbf16> to vector<8x16xbf16>
    %16 = vector.extract_strided_slice %8 {offsets = [0, 48], sizes = [8, 16], strides = [1, 1]} : vector<8x64xbf16> to vector<8x16xbf16>
    %17 = vector.shape_cast %13 : vector<8x16xbf16> to vector<1x8x16xbf16>
    %18 = vector.shape_cast %14 : vector<8x16xbf16> to vector<1x8x16xbf16>
    %19 = vector.shape_cast %15 : vector<8x16xbf16> to vector<1x8x16xbf16>
    %20 = vector.shape_cast %16 : vector<8x16xbf16> to vector<1x8x16xbf16>
    %21 = tpu.concatenate %17, %18, %19, %20 in 0 : vector<1x8x16xbf16>, vector<1x8x16xbf16>, vector<1x8x16xbf16>, vector<1x8x16xbf16> -> vector<4x8x16xbf16>
    %22 = vector.extract_strided_slice %10 {offsets = [0, 0], sizes = [8, 16], strides = [1, 1]} : vector<8x64xbf16> to vector<8x16xbf16>
    %23 = vector.extract_strided_slice %10 {offsets = [0, 16], sizes = [8, 16], strides = [1, 1]} : vector<8x64xbf16> to vector<8x16xbf16>
    %24 = vector.extract_strided_slice %10 {offsets = [0, 32], sizes = [8, 16], strides = [1, 1]} : vector<8x64xbf16> to vector<8x16xbf16>
    %25 = vector.extract_strided_slice %10 {offsets = [0, 48], sizes = [8, 16], strides = [1, 1]} : vector<8x64xbf16> to vector<8x16xbf16>
    %26 = vector.shape_cast %22 : vector<8x16xbf16> to vector<1x8x16xbf16>
    %27 = vector.shape_cast %23 : vector<8x16xbf16> to vector<1x8x16xbf16>
    %28 = vector.shape_cast %24 : vector<8x16xbf16> to vector<1x8x16xbf16>
    %29 = vector.shape_cast %25 : vector<8x16xbf16> to vector<1x8x16xbf16>
    %30 = tpu.concatenate %26, %27, %28, %29 in 0 : vector<1x8x16xbf16>, vector<1x8x16xbf16>, vector<1x8x16xbf16>, vector<1x8x16xbf16> -> vector<4x8x16xbf16>
    %31 = vector.extract_strided_slice %12 {offsets = [0, 0], sizes = [8, 16], strides = [1, 1]} : vector<8x64xbf16> to vector<8x16xbf16>
    %32 = vector.extract_strided_slice %12 {offsets = [0, 16], sizes = [8, 16], strides = [1, 1]} : vector<8x64xbf16> to vector<8x16xbf16>
    %33 = vector.extract_strided_slice %12 {offsets = [0, 32], sizes = [8, 16], strides = [1, 1]} : vector<8x64xbf16> to vector<8x16xbf16>
    %34 = vector.extract_strided_slice %12 {offsets = [0, 48], sizes = [8, 16], strides = [1, 1]} : vector<8x64xbf16> to vector<8x16xbf16>
    %35 = vector.shape_cast %31 : vector<8x16xbf16> to vector<1x8x16xbf16>
    %36 = vector.shape_cast %32 : vector<8x16xbf16> to vector<1x8x16xbf16>
    %37 = vector.shape_cast %33 : vector<8x16xbf16> to vector<1x8x16xbf16>
    %38 = vector.shape_cast %34 : vector<8x16xbf16> to vector<1x8x16xbf16>
    %39 = tpu.concatenate %35, %36, %37, %38 in 0 : vector<1x8x16xbf16>, vector<1x8x16xbf16>, vector<1x8x16xbf16>, vector<1x8x16xbf16> -> vector<4x8x16xbf16>
    "tpu.trace_start"() <{level = 10 : i32, message = "hid,hjd->hij"}> : () -> ()
    %cst_5 = arith.constant dense<0.000000e+00> : vector<4x8x8xf32>
    %40 = tpu.matmul %21, %30, %cst_5 {dimension_numbers = #tpu.dot_dimension_numbers<[2], [2], [1], [1], [0, 0, 0, 1, 1, 1], [0], [0]>} : vector<4x8x16xbf16>, vector<4x8x16xbf16>, vector<4x8x8xf32> -> vector<4x8x8xf32>
    "tpu.trace_stop"() : () -> ()
    %c0_6 = arith.constant 0 : index
    %c0_7 = arith.constant 0 : index
    %41 = vector.load %arg3[%c0_6, %c0_7] : memref<15x16xbf16, #tpu.memory_space<vmem>>, vector<15x16xbf16>
    %42 = vector.shape_cast %41 : vector<15x16xbf16> to vector<1x15x16xbf16>
    %43 = vector.broadcast %42 : vector<1x15x16xbf16> to vector<4x15x16xbf16>
    "tpu.trace_start"() <{level = 10 : i32, message = "hid,hrd->hir"}> : () -> ()
    %cst_8 = arith.constant dense<0.000000e+00> : vector<4x8x15xf32>
    %44 = tpu.matmul %21, %43, %cst_8 {dimension_numbers = #tpu.dot_dimension_numbers<[2], [2], [1], [1], [0, 0, 0, 1, 1, 1], [0], [0]>} : vector<4x8x16xbf16>, vector<4x15x16xbf16>, vector<4x8x15xf32> -> vector<4x8x15xf32>
    "tpu.trace_stop"() : () -> ()
    %45 = vector.extract_strided_slice %44 {offsets = [0, 0, 7], sizes = [4, 1, 8], strides = [1, 1, 1]} : vector<4x8x15xf32> to vector<4x1x8xf32>
    %46 = vector.extract_strided_slice %44 {offsets = [0, 1, 6], sizes = [4, 1, 8], strides = [1, 1, 1]} : vector<4x8x15xf32> to vector<4x1x8xf32>
    %47 = vector.extract_strided_slice %44 {offsets = [0, 2, 5], sizes = [4, 1, 8], strides = [1, 1, 1]} : vector<4x8x15xf32> to vector<4x1x8xf32>
    %48 = vector.extract_strided_slice %44 {offsets = [0, 3, 4], sizes = [4, 1, 8], strides = [1, 1, 1]} : vector<4x8x15xf32> to vector<4x1x8xf32>
    %49 = vector.extract_strided_slice %44 {offsets = [0, 4, 3], sizes = [4, 1, 8], strides = [1, 1, 1]} : vector<4x8x15xf32> to vector<4x1x8xf32>
    %50 = vector.extract_strided_slice %44 {offsets = [0, 5, 2], sizes = [4, 1, 8], strides = [1, 1, 1]} : vector<4x8x15xf32> to vector<4x1x8xf32>
    %51 = vector.extract_strided_slice %44 {offsets = [0, 6, 1], sizes = [4, 1, 8], strides = [1, 1, 1]} : vector<4x8x15xf32> to vector<4x1x8xf32>
    %52 = vector.extract_strided_slice %44 {offsets = [0, 7, 0], sizes = [4, 1, 8], strides = [1, 1, 1]} : vector<4x8x15xf32> to vector<4x1x8xf32>
    %53 = tpu.concatenate %45, %46, %47, %48, %49, %50, %51, %52 in 1 : vector<4x1x8xf32>, vector<4x1x8xf32>, vector<4x1x8xf32>, vector<4x1x8xf32>, vector<4x1x8xf32>, vector<4x1x8xf32>, vector<4x1x8xf32>, vector<4x1x8xf32> -> vector<4x8x8xf32>
    %54 = arith.addf %40, %53 : vector<4x8x8xf32>
    %cst_9 = arith.constant dense<0xFF800000> : vector<4x8xf32>
    %55 = vector.multi_reduction <maximumf>, %54, %cst_9 [2] : vector<4x8x8xf32> to vector<4x8xf32>
    %56 = vector.shape_cast %55 : vector<4x8xf32> to vector<4x8x1xf32>
    %57 = vector.broadcast %56 : vector<4x8x1xf32> to vector<4x8x8xf32>
    %58 = arith.subf %54, %57 : vector<4x8x8xf32>
    %59 = math.exp %58 : vector<4x8x8xf32>
    %cst_10 = arith.constant dense<0.000000e+00> : vector<4x8xf32>
    %60 = vector.multi_reduction <add>, %59, %cst_10 [2] : vector<4x8x8xf32> to vector<4x8xf32>
    %61 = vector.shape_cast %60 : vector<4x8xf32> to vector<4x8x1xf32>
    %62 = tpu.reciprocal %61 {approx = true} : vector<4x8x1xf32> -> vector<4x8x1xf32>
    %63 = vector.broadcast %62 : vector<4x8x1xf32> to vector<4x8x8xf32>
    %64 = arith.mulf %59, %63 : vector<4x8x8xf32>
    %65 = arith.truncf %64 : vector<4x8x8xf32> to vector<4x8x8xbf16>
    "tpu.trace_start"() <{level = 10 : i32, message = "hij,hjd->hid"}> : () -> ()
    %cst_11 = arith.constant dense<0.000000e+00> : vector<4x8x16xf32>
    %66 = tpu.matmul %65, %39, %cst_11 {dimension_numbers = #tpu.dot_dimension_numbers<[2], [1], [1], [2], [0, 0, 0, 1, 1, 2], [0], [0]>} : vector<4x8x8xbf16>, vector<4x8x16xbf16>, vector<4x8x16xf32> -> vector<4x8x16xf32>
    "tpu.trace_stop"() : () -> ()
    %67 = arith.truncf %66 : vector<4x8x16xf32> to vector<4x8x16xbf16>
    %68 = vector.extract_strided_slice %67 {offsets = [0, 0, 0], sizes = [1, 8, 16], strides = [1, 1, 1]} : vector<4x8x16xbf16> to vector<1x8x16xbf16>
    %69 = vector.shape_cast %68 : vector<1x8x16xbf16> to vector<8x16xbf16>
    %70 = vector.extract_strided_slice %67 {offsets = [1, 0, 0], sizes = [1, 8, 16], strides = [1, 1, 1]} : vector<4x8x16xbf16> to vector<1x8x16xbf16>
    %71 = vector.shape_cast %70 : vector<1x8x16xbf16> to vector<8x16xbf16>
    %72 = vector.extract_strided_slice %67 {offsets = [2, 0, 0], sizes = [1, 8, 16], strides = [1, 1, 1]} : vector<4x8x16xbf16> to vector<1x8x16xbf16>
    %73 = vector.shape_cast %72 : vector<1x8x16xbf16> to vector<8x16xbf16>
    %74 = vector.extract_strided_slice %67 {offsets = [3, 0, 0], sizes = [1, 8, 16], strides = [1, 1, 1]} : vector<4x8x16xbf16> to vector<1x8x16xbf16>
    %75 = vector.shape_cast %74 : vector<1x8x16xbf16> to vector<8x16xbf16>
    %76 = tpu.concatenate %69, %71, %73, %75 in 1 : vector<8x16xbf16>, vector<8x16xbf16>, vector<8x16xbf16>, vector<8x16xbf16> -> vector<8x64xbf16>
    %c0_12 = arith.constant 0 : index
    %c0_13 = arith.constant 0 : index
    %77 = vector.load %arg4[%c0_12, %c0_13] : memref<64x32xbf16, #tpu.memory_space<vmem>>, vector<64x32xbf16>
    %cst_14 = arith.constant dense<0.000000e+00> : vector<8x32xf32>
    %78 = tpu.matmul %76, %77, %cst_14 {dimension_numbers = #tpu.dot_dimension_numbers<[1], [0], [0], [1], [0, 0, 1, 1], [], []>} : vector<8x64xbf16>, vector<64x32xbf16>, vector<8x32xf32> -> vector<8x32xf32>
    %c0_15 = arith.constant 0 : index
    %c0_16 = arith.constant 0 : index
    %79 = vector.load %arg5[%c0_15, %c0_16] : memref<1x32xf32, #tpu.memory_space<vmem>>, vector<1x32xf32>
    %80 = vector.broadcast %79 : vector<1x32xf32> to vector<8x32xf32>
    %81 = arith.addf %78, %80 : vector<8x32xf32>
    %c0_17 = arith.constant 0 : index
    %c0_18 = arith.constant 0 : index
    %c0_19 = arith.constant 0 : index
    %82 = vector.load %arg6[%c0_17, %c0_18, %c0_19] : memref<1x8x32xf32, #tpu.memory_space<vmem>>, vector<1x8x32xf32>
    %83 = vector.shape_cast %82 : vector<1x8x32xf32> to vector<8x32xf32>
    %84 = vector.shape_cast %81 : vector<8x32xf32> to vector<1x8x32xf32>
    tpu.vector_store %arg6[%c0_17, %c0_18, %c0_19], %84 {strides = array<i32>} : memref<1x8x32xf32, #tpu.memory_space<vmem>>, vector<1x8x32xf32>,
    return
  }
  func.func @transform_0(%arg0: i32) -> (i32, i32, i32) {
    %c0_i32 = arith.constant 0 : i32
    %c0_i32_0 = arith.constant 0 : i32
    %c0_i32_1 = arith.constant 0 : i32
    return %arg0, %c0_i32, %c0_i32_0 : i32, i32, i32
  }
  func.func @transform_1(%arg0: i32) -> (i32, i32) {
    %c0_i32 = arith.constant 0 : i32
    %c0_i32_0 = arith.constant 0 : i32
    %c0_i32_1 = arith.constant 0 : i32
    return %c0_i32, %c0_i32_0 : i32, i32
  }
  func.func @transform_2(%arg0: i32) -> (i32, i32) {
    %c0_i32 = arith.constant 0 : i32
    %c0_i32_0 = arith.constant 0 : i32
    %c0_i32_1 = arith.constant 0 : i32
    return %c0_i32, %c0_i32_0 : i32, i32
  }
  func.func @transform_3(%arg0: i32) -> (i32, i32) {
    %c0_i32 = arith.constant 0 : i32
    %c0_i32_0 = arith.constant 0 : i32
    %c0_i32_1 = arith.constant 0 : i32
    return %c0_i32, %c0_i32_0 : i32, i32
  }
  func.func @transform_4(%arg0: i32) -> (i32, i32) {
    %c0_i32 = arith.constant 0 : i32
    %c0_i32_0 = arith.constant 0 : i32
    %c0_i32_1 = arith.constant 0 : i32
    return %c0_i32, %c0_i32_0 : i32, i32
  }
  func.func @transform_5(%arg0: i32) -> (i32, i32, i32) {
    %c0_i32 = arith.constant 0 : i32
    %c0_i32_0 = arith.constant 0 : i32
    %c0_i32_1 = arith.constant 0 : i32
    return %arg0, %c0_i32, %c0_i32_0 : i32, i32, i32
  }
}

</mosaic_0001>

<bundles_post_ra>
// kernel: tpu_custom_call.1
= control target key start
LH: loop header
LB: loop body
LE: loop exit
PB: predicated region body
PF: predicated region fallthrough
CT: control target
= control target key end

     0   :  { %10 = vsyncpa [#allocation3], 0  ;;  %s1494_s0 = inlined_call_operand.vmem [shape: f32[2,8,32], index: 0, kind: input, shape index: {}]   ;;  %s1495_s1 = inlined_call_operand.vmem [shape: bf16[32,192], index: 1, kind: input, shape index: {}]   ;;  %s1496_s2 = inlined_call_operand.hbm [shape: bf16[15,16], index: 2, kind: input, shape index: {}]   ;;  %s1497_s3 = inlined_call_operand.vmem [shape: bf16[64,32], index: 3, kind: input, shape index: {}]   ;;  %s1498_s4 = inlined_call_operand.vmem [shape: f32[1,32], index: 4, kind: input, shape index: {}]   ;;  %s1499_s5 = inlined_call_operand.hbm [shape: f32[2,8,32], index: 5, kind: output, shape index: {}]  }
   0x1   :  { %11 = vsyncpa [#allocation4], 0 }
   0x2   :  { %13 = vsyncpa [#allocation4 + $0x1], 0  ;;  %s1207_s18 = smov 0   ;;  %s1209_s19 = smov 0  }
   0x3   :  { %s1211_s20 = smov 0   ;;  %s1213_s21 = smov 0  }
   0x4 LB: > { %s1228_s22 = sadd.s32 4294967295, %s1157_s21   ;;  %s905_s23 = sadd.s32 4294967294, %s1157_s21   ;;  %s1157_s21 = sphi %s1213_s21, %s1505_s21   ;;  %s1153_s20 = sphi %s1211_s20, %s1504_s20   ;;  %s1149_s19 = sphi %s1209_s19, %s1503_s19   ;;  %s1145_s18 = sphi %s1207_s18, %s1502_s18  }
   0x5   : > { %s1232_s24 = sadd.s32 1, %s1157_s21   ;;  %s136_s25 = sadd.s32 1, %s1153_s20 }
   0x6   : > { %s133_s26 = ssub.s32 %s1157_s21, %s1232_s24  ;;  %p146_p0 = scmp.ne.s32.totalorder %s1153_s20, %s1149_s19 }
   0x7   : > { %p134_p1 = scmp.eq.s32.totalorder %s133_s26, 0  ;;  %p147_p2 = scmp.eq.s32.totalorder %s1228_s22, 1 }
   0x8   : > { %p152_p3 = scmp.ne.s32.totalorder %s1149_s19, %s1145_s18  ;;  %p153_p4 = scmp.eq.s32.totalorder %s905_s23, 1 }
   0x9   : > { %s1243_s27 = scalar_select %p134_p1, %s1153_s20, %s136_s25  }
   0xa   : > { %p1245_p5 = por %p147_p2, %p146_p0  ;;  %p1249_p6 = por %p153_p4, %p152_p3 }
   0xb   : > { %p906_p7 = scmp.ge.s32.totalorder %s1157_s21, 1  ;;  %p160_p8 = scmp.lt.s32.totalorder %s1157_s21, 3 }
   0xc   : > { %p991_p9 = scmp.eq.s32.totalorder %s1228_s22, 0  ;;  %s174_s7 = sshll.u32 %s1496_s2, 4  ;;  %s175_s7 = int_to_ptr.hbm [resolvable:$true] %s174_s7 }
   0xd   : > { %p161_p10 = pnand %p906_p7, %p160_p8  ;;  %s1159_s8 = smov [#allocation2]  }
   0xe   : > { %s176_s9 = sshll.u32 %s1159_s8, 4  ;;  %s1160_s10 = smov 64   ;;  %s177_s9 = int_to_ptr.vmem [resolvable:$true] %s176_s9 }
   0xf   : > { %p983_p11 = pneg %p161_p10  ;;  %s1161_s11 = smov 4  }
  0x10   : > { %205 = sbr.rel (%p161_p10) target bundleno = 1365 (0x555), region = 40 }
  0x11   : > { %p984_p12 = pnand %p991_p9, %p983_p11 }
  0x13   : > { %986 = dma.hbm_to_vmem [thread:$0]  (!%p984_p12), %s175_s7, 128, %s177_s9, [#allocation3], %s1160_s10, %s1160_s10, %s1161_s11  }
  0x15   : > { %1136 = dma.done.wait (%p991_p9), [#allocation3], 128  }
  0x16   : > { %1138 = vsyncadd (%p991_p9), [#allocation3], 4294967168  ;;  %p233_p13 = scmp.lt.s32.totalorder %s1228_s22, 1  ;;  %vm326_vm0 = vcmask 130048   ;;  %v923_v0 = vld [vmem:[%s1495_s1 + $0x10] sm:$0xf] }
  0x17   : > { %v971_v1 = vld [vmem:[%s1495_s1 + $0x14] sm:$0xf0]  ;;  %v915_v2 = vld [vmem:[%s1495_s1] sm:$0xf]  ;;  %v969_v4 = vld [vmem:[%s1495_s1 + $0x4] sm:$0xf0] }
  0x18   : > { %s234_s12 = scalar_select %p233_p13, %s1228_s22, 1  ;;  %v924_v3 = vor.u32 %v971_v1, %v923_v0  ;;  %v972_v5 = vld [vmem:[#allocation2] sm:$0xff]  ;;  %v916_v6 = vor.u32 %v969_v4, %v915_v2  ;;  %vm264_vm1 = vcmask 261120   ;;  %v970_v15 = vld [vmem:[%s1495_s1 + $0x14] sm:$0xf]  ;;  %vm497_vm2 = vcmask 1043456  }
  0x19   : > { %v331_v8 = vsel %vm326_vm0, %v972_v5, 0  ;;  %s1162_s9 = smov 96   ;;  %s1163_s10 = smov 80   ;;  %v925_v16 = vld [vmem:[%s1495_s1 + $0x18] sm:$0xf0]  ;;  %vm482_vm3 = vcmask 1040384  }
  0x1a   : > { %s912_s13 = sshll.u32 %s234_s12, 3  ;;  %274 = vmatpush.bf16.msra.mxu0 %v924_v3  ;;  %340 = vmatpush.bf16.xpose.msra.mxu2 %v331_v8  ;;  %s1164_s11 = smov 112   ;;  %v928_v17 = vor.u32 %v970_v15, %v925_v16  ;;  %v968_v18 = vld [vmem:[%s1495_s1 + $0x4] sm:$0xf]  ;;  %v917_v19 = vld [vmem:[%s1495_s1 + $0x8] sm:$0xf0] }
  0x1b   : > { %s236_s6 = scalar_lea.vmem %s1494_s0, %s912_s13  ;;  %356 = vmatpush.bf16.xpose.msra.mxu3 %v331_v8  ;;  %v920_v20 = vor.u32 %v968_v18, %v917_v19  ;;  %s1165_s26 = smov 64   ;;  %vm487_vm4 = vcmask 1041408   ;;  %vm492_vm5 = vcmask 1042432   ;;  %vm502_vm6 = vcmask 1044480  }
  0x1c   : > { %v238_v7 = vld [vmem:[%s236_s6] sm:$0xff]  ;;  %287 = vmatpush.bf16.msra.mxu1 %v928_v17  ;;  %s1166_s30 = smov 1   ;;  %s1167_s6 = smov 3   ;;  %vm507_vm7 = vcmask 1045504   ;;  %vm512_vm8 = vcmask 1046528   ;;  %vm613_vm9 = vcmask 64512  }
  0x1d   : > { %v239_v9 = vpack.c.bf16 %v238_v7, %v238_v7  ;;  %s1168_s7 = smov 2   ;;  %s1169_s8 = smov 4   ;;  %vm762_vm10 = vcmask 392192   ;;  %vm801_vm11 = vcmask 523264  }
  0x1e   : > { %275 = vmatpush.bf16.msra.mxu0 %v916_v6  ;;  %s1170_s12 = smov 5   ;;  %s1171_s13 = smov 6  }
  0x1f   : > { %s1172_s14 = smov 7   ;;  %s1173_s15 = smov 121  }
  0x20   : > { %288 = vmatpush.bf16.msra.mxu1 %v920_v20 }
  0x21   : > { %929 = vmatmul.msk.bf16.vlgmr.msra.gmra.mxu0 %vm264_vm1, %v239_v9 }
  0x22   : > { %372 = vmatpush.bf16.xpose.msrb.mxu0 %v331_v8 }
  0x23   : > { %930 = vmatmul.msk.bf16.vlgmr.msra.gmra.mxu1 %vm264_vm1, %v239_v9 }
  0x24   : > { %388 = vmatpush.bf16.xpose.msrb.mxu1 %v331_v8 }
  0x9e   : > { %v277_v10 = vpop.f32.mrf.mxu0 }
  0x9f   : > { %v294_v11 = vmul.f32 0.25, %v277_v10  ;;  %v296_v12 = vpack.c.bf16 %v277_v10, %v277_v10 }
  0xa0   : > { %v290_v39 = vpop.f32.mrf.mxu1 }
  0xa1   : > { %v1284_v13 = vpack.c.bf16 %v294_v11, %v294_v11  ;;  %308 = vrot.lane.b32.xlu2 %v296_v12, %s1162_s9  ;;  %v517_v33 = vunpack.c.l.b16 %v296_v12  ;;  %v1326_v47 = vpack.c.bf16 %v290_v39, %v290_v39 }
  0xa3   : > { %303 = vrot.lane.b32.xlu1 %v1284_v13, %s1163_s10  ;;  %299 = vrot.lane.b32.xlu0 %v1284_v13, %s1164_s11  ;;  %v518_v35 = vpack.c.b16 %v517_v33, %v517_v33  ;;  %v666_v52 = vsel %vm497_vm2, %v1326_v47, 0 }
  0xa4   : > { %935 = vmatmul.msk.bf16.vlgmr.msra.gmra.mxu2 %vm326_vm0, %v1284_v13 }
  0xa6   : > { %v279_v14 = vpop.f32.mrf.mxu0 }
  0xa8   : > { %v292_v40 = vpop.f32.mrf.mxu1 }
  0xa9   : > { %310 = vrot.lane.b32.xlu2 %v296_v12, %s1163_s10 }
  0xab   : > { %306 = vrot.lane.b32.xlu1 %v296_v12, %s1164_s11  ;;  %301 = vrot.lane.b32.xlu0 %v1284_v13, %s1162_s9 }
  0xfb   : > { %v309_v21 = vpop.permute.xlu2 %308 }
  0xfc   : > { %v565_v22 = vunpack.c.l.b16 %v309_v21 }
  0xfe   : > { %v566_v23 = vpack.c.b16 %v565_v22, %v565_v22 }
 0x100   : > { %567 = vrot.lane.b32.xlu1 %v566_v23, %s1165_s26 }
 0x103   : > { %v311_v24 = vpop.permute.xlu2 %310 }
 0x104   : > { %v589_v25 = vunpack.c.l.b16 %v311_v24 }
 0x106   : > { %v590_v26 = vpack.c.b16 %v589_v25, %v589_v25 }
 0x108   : > { %591 = vrot.lane.b32.xlu2 %v590_v26, %s1165_s26 }
 0x115   : > { %v304_v27 = vpop.permute.xlu1 %303  ;;  %v300_v28 = vpop.permute.xlu0 %299 }
 0x116   : > { %936 = vmatmul.msk.bf16.vlgmr.msra.gmra.mxu3 %vm326_vm0, %v300_v28  ;;  %938 = vmatmul.msk.bf16.vlgmr.msrb.gmra.mxu1 %vm326_vm0, %v304_v27 }
 0x11d   : > { %v307_v29 = vpop.permute.xlu1 %306  ;;  %v302_v30 = vpop.permute.xlu0 %301 }
 0x11e   : > { %v541_v31 = vunpack.c.l.b16 %v307_v29  ;;  %937 = vmatmul.msk.bf16.vlgmr.msrb.gmra.mxu0 %vm326_vm0, %v302_v30 }
 0x120   : > { %v542_v32 = vpack.c.b16 %v541_v31, %v541_v31 }
 0x122   : > { %543 = vrot.lane.b32.xlu0 %v542_v32, %s1165_s26 }
 0x127   : > { %v1313_v34 = vpop.f32.mrf.mxu2 }
 0x12a   : > { %519 = vrot.lane.b32.xlu0 %v518_v35, %s1165_s26 }
 0x12f   : > { %v344_v36 = vpop.f32.mrf.mxu2 }
 0x162   : > { %v592_v37 = vpop.permute.xlu2 %591 }
 0x163   : > { %v598_v38 = vsel %vm326_vm0, %v592_v37, 0 }
 0x164   : > { %607 = vmatpush.bf16.xpose.msra.mxu1 %v598_v38 }
 0x16b   : > { %942 = vmatmul.msk.bf16.vlgmr.msra.gmra.mxu1 %vm326_vm0, %v304_v27 }
 0x172   : > { %v568_v41 = vpop.permute.xlu1 %567 }
 0x173   : > { %v574_v42 = vsel %vm326_vm0, %v568_v41, 0 }
 0x174   : > { %583 = vmatpush.bf16.xpose.msra.mxu0 %v574_v42 }
 0x17b   : > { %941 = vmatmul.msk.bf16.vlgmr.msra.gmra.mxu0 %vm326_vm0, %v302_v30 }
 0x193   : > { %v1319_v43 = vpop.f32.mrf.mxu1 }
 0x194   : > { %404 = vrot.lane.b32.xlu0 %v1319_v43, %s1166_s30  ;;  %v544_v44 = vpop.permute.xlu0 %543 }
 0x195   : > { %v550_v45 = vsel %vm326_vm0, %v544_v44, 0 }
 0x196   : > { %559 = vmatpush.bf16.xpose.msrb.mxu3 %v550_v45 }
 0x199   : > { %v1324_v46 = vpop.f32.mrf.mxu3 }
 0x19b   : > { %v1328_v48 = vpop.f32.mrf.mxu0  ;;  %v392_v49 = vpop.f32.mrf.mxu1 }
 0x19c   : > { %v520_v50 = vpop.permute.xlu0 %519  ;;  %426 = vrot.lane.b32.xlu0 %v1328_v48, %s1167_s6  ;;  %414 = vrot.lane.b32.xlu1 %v1328_v48, %s1168_s7 }
 0x19d   : > { %402 = vrot.lane.b32.xlu2 %v1328_v48, %s1166_s30  ;;  %940 = vmatmul.msk.bf16.vlgmr.msrb.gmra.mxu3 %vm326_vm0, %v300_v28  ;;  %v526_v51 = vsel %vm326_vm0, %v520_v50, 0 }
 0x19e   : > { %535 = vmatpush.bf16.xpose.msrb.mxu2 %v526_v51 }
 0x1a1   : > { %v360_v53 = vpop.f32.mrf.mxu3 }
 0x1a3   : > { %v376_v54 = vpop.f32.mrf.mxu0 }
 0x1a4   : > { %440 = vrot.lane.b32.xlu0 %v1319_v43, %s1169_s8  ;;  %428 = vrot.lane.b32.xlu1 %v1319_v43, %s1167_s6 }
 0x1a5   : > { %416 = vrot.lane.b32.xlu2 %v1319_v43, %s1168_s7  ;;  %939 = vmatmul.msk.bf16.vlgmr.msrb.gmra.mxu2 %vm326_vm0, %v1284_v13 }
 0x1a6   : > { %675 = vmatpush.bf16.msra.mxu2 %v666_v52 }
 0x1ac   : > { %424 = vrot.lane.b32.xlu0 %v1324_v46, %s1167_s6  ;;  %450 = vrot.lane.b32.xlu1 %v1328_v48, %s1170_s12 }
 0x1ad   : > { %438 = vrot.lane.b32.xlu2 %v1328_v48, %s1169_s8 }
 0x1b4   : > { %460 = vrot.lane.b32.xlu0 %v1324_v46, %s1171_s13  ;;  %400 = vrot.lane.b32.xlu1 %v1324_v46, %s1166_s30 }
 0x1b5   : > { %412 = vrot.lane.b32.xlu2 %v1324_v46, %s1168_s7 }
 0x1bc   : > { %462 = vrot.lane.b32.xlu0 %v1328_v48, %s1171_s13  ;;  %436 = vrot.lane.b32.xlu1 %v1324_v46, %s1169_s8 }
 0x1bd   : > { %448 = vrot.lane.b32.xlu2 %v1324_v46, %s1170_s12 }
 0x1c4   : > { %476 = vrot.lane.b32.xlu0 %v1319_v43, %s1172_s14  ;;  %472 = vrot.lane.b32.xlu1 %v1324_v46, %s1172_s14 }
 0x1c5   : > { %452 = vrot.lane.b32.xlu2 %v1319_v43, %s1170_s12 }
 0x1cc   : > { %422 = vrot.lane.b32.xlu0 %v1313_v34, %s1167_s6  ;;  %464 = vrot.lane.b32.xlu1 %v1319_v43, %s1171_s13 }
 0x1cd   : > { %474 = vrot.lane.b32.xlu2 %v1328_v48, %s1172_s14 }
 0x1d4   : > { %446 = vrot.lane.b32.xlu0 %v1313_v34, %s1170_s12  ;;  %398 = vrot.lane.b32.xlu1 %v1313_v34, %s1166_s30  ;;  %s965_s12 = sshll.u32 %s1228_s22, 3 }
 0x1d5   : > { %410 = vrot.lane.b32.xlu2 %v1313_v34, %s1168_s7  ;;  %s1111_s7 = scalar_lea.hbm %s1499_s5, 16 }
 0x1dc   : > { %434 = vrot.lane.b32.xlu1 %v1313_v34, %s1169_s8  ;;  %s230_s8 = sand.u32 1, %s1149_s19  }
 0x1dd   : > { %s819_s22 = scalar_lea.sflag [#allocation4], %s230_s8 }
 0x1e4   : > { %458 = vrot.lane.b32.xlu1 %v1313_v34, %s1171_s13  ;;  %s911_s13 = sshll.u32 %s230_s8, 3 }
 0x1e5   : > { %s232_s16 = scalar_lea.vmem [#allocation5], %s911_s13 }
 0x1e6   : > { %s831_s17 = sshll.u32 %s232_s16, 4  ;;  %s832_s17 = int_to_ptr.vmem [resolvable:$true] %s831_s17 }
 0x1e8   : > { %v1376_v55 = vpop.f32.mrf.mxu1 }
 0x1f0   : > { %v611_v56 = vpop.f32.mrf.mxu1 }
 0x1f7   : > { %v403_v57 = vpop.permute.xlu2 %402 }
 0x1f8   : > { %v1378_v58 = vpop.f32.mrf.mxu0  ;;  %v485_v9 = vsel %vm482_vm3, %v1328_v48, %v403_v57 }
 0x1ff   : > { %v417_v59 = vpop.permute.xlu2 %416 }
 0x200   : > { %v587_v60 = vpop.f32.mrf.mxu0 }
 0x206   : > { %v405_v61 = vpop.permute.xlu0 %404 }
 0x207   : > { %v439_v62 = vpop.permute.xlu2 %438  ;;  %v486_v29 = vsel %vm482_vm3, %v1319_v43, %v405_v61 }
 0x208   : > { %v491_v33 = vsel %vm487_vm4, %v486_v29, %v417_v59 }
 0x20e   : > { %v427_v63 = vpop.permute.xlu0 %426  ;;  %v415_v0 = vpop.permute.xlu1 %414 }
 0x20f   : > { %v413_v1 = vpop.permute.xlu2 %412  ;;  %v490_v12 = vsel %vm487_vm4, %v485_v9, %v415_v0 }
 0x210   : > { %v495_v16 = vsel %vm492_vm5, %v490_v12, %v427_v63 }
 0x211   : > { %v500_v18 = vsel %vm497_vm2, %v495_v16, %v439_v62 }
 0x216   : > { %v441_v2 = vpop.permute.xlu0 %440  ;;  %v429_v3 = vpop.permute.xlu1 %428 }
 0x217   : > { %v449_v4 = vpop.permute.xlu2 %448  ;;  %v496_v35 = vsel %vm492_vm5, %v491_v33, %v429_v3 }
 0x218   : > { %v501_v37 = vsel %vm497_vm2, %v496_v35, %v441_v2 }
 0x21e   : > { %v425_v5 = vpop.permute.xlu0 %424  ;;  %v451_v6 = vpop.permute.xlu1 %450 }
 0x21f   : > { %v453_v8 = vpop.permute.xlu2 %452  ;;  %v505_v19 = vsel %vm502_vm6, %v500_v18, %v451_v6 }
 0x220   : > { %v561_v7 = vpop.f32.mrf.mxu3  ;;  %v506_v38 = vsel %vm502_vm6, %v501_v37, %v453_v8 }
 0x226   : > { %v461_v10 = vpop.permute.xlu0 %460  ;;  %v401_v11 = vpop.permute.xlu1 %400 }
 0x227   : > { %v484_v15 = vsel %vm482_vm3, %v1324_v46, %v401_v11  ;;  %v475_v22 = vpop.permute.xlu2 %474 }
 0x228   : > { %v1383_v13 = vpop.f32.mrf.mxu2  ;;  %v563_v14 = vpop.f32.mrf.mxu3  ;;  %v489_v17 = vsel %vm487_vm4, %v484_v15, %v413_v1 }
 0x229   : > { %v494_v24 = vsel %vm492_vm5, %v489_v17, %v425_v5 }
 0x22e   : > { %v463_v20 = vpop.permute.xlu0 %462  ;;  %v437_v21 = vpop.permute.xlu1 %436 }
 0x22f   : > { %v510_v23 = vsel %vm507_vm7, %v505_v19, %v463_v20  ;;  %v499_v25 = vsel %vm497_vm2, %v494_v24, %v437_v21  ;;  %v411_v44 = vpop.permute.xlu2 %410 }
 0x230   : > { %v539_v26 = vpop.f32.mrf.mxu2  ;;  %v515_v27 = vsel %vm512_vm8, %v510_v23, %v475_v22  ;;  %v504_v28 = vsel %vm502_vm6, %v499_v25, %v449_v4 }
 0x231   : > { %570 = vrot.lane.b32.xlu0 %v515_v27, %s1173_s15  ;;  %v509_v31 = vsel %vm507_vm7, %v504_v28, %v461_v10 }
 0x236   : > { %v473_v30 = vpop.permute.xlu1 %472  ;;  %v477_v36 = vpop.permute.xlu0 %476 }
 0x237   : > { %v514_v32 = vsel %vm512_vm8, %v509_v31, %v473_v30 }
 0x238   : > { %546 = vrot.lane.b32.xlu2 %v514_v32, %s1173_s15 }
 0x23e   : > { %v465_v39 = vpop.permute.xlu1 %464  ;;  %v423_v42 = vpop.permute.xlu0 %422 }
 0x23f   : > { %v511_v40 = vsel %vm507_vm7, %v506_v38, %v465_v39 }
 0x240   : > { %470 = vrot.lane.b32.xlu2 %v1313_v34, %s1172_s14  ;;  %v516_v41 = vsel %vm512_vm8, %v511_v40, %v477_v36 }
 0x241   : > { %594 = vrot.lane.b32.xlu1 %v516_v41, %s1173_s15 }
 0x246   : > { %v399_v43 = vpop.permute.xlu1 %398  ;;  %v447_v50 = vpop.permute.xlu0 %446 }
 0x247   : > { %v483_v45 = vsel %vm482_vm3, %v1313_v34, %v399_v43 }
 0x248   : > { %v488_v46 = vsel %vm487_vm4, %v483_v45, %v411_v44 }
 0x249   : > { %v493_v48 = vsel %vm492_vm5, %v488_v46, %v423_v42 }
 0x24e   : > { %v435_v49 = vpop.permute.xlu1 %434 }
 0x24f   : > { %v498_v51 = vsel %vm497_vm2, %v493_v48, %v435_v49 }
 0x250   : > { %v503_v52 = vsel %vm502_vm6, %v498_v51, %v447_v50 }
 0x256   : > { %v459_v53 = vpop.permute.xlu1 %458 }
 0x257   : > { %v508_v54 = vsel %vm507_vm7, %v503_v52, %v459_v53 }
 0x292   : > { %v547_v56 = vpop.permute.xlu2 %546 }
 0x293   : > { %v562_v57 = vadd.f32 %v561_v7, %v547_v56 }
 0x295   : > { %v617_v59 = vsel %vm613_vm9, %v562_v57, -inf }
 0x296   : > { %618 = vmax.xlane.f32.xlu2 %v617_v59 }
 0x29a   : > { %v471_v34 = vpop.permute.xlu2 %470 }
 0x29b   : > { %v513_v60 = vsel %vm512_vm8, %v508_v54, %v471_v34 }
 0x29c   : > { %522 = vrot.lane.b32.xlu0 %v513_v60, %s1173_s15 }
 0x2a3   : > { %v571_v61 = vpop.permute.xlu0 %570 }
 0x2a4   : > { %v586_v62 = vadd.f32 %v1378_v58, %v571_v61 }
 0x2a6   : > { %v620_v63 = vsel %vm613_vm9, %v586_v62, -inf }
 0x2a7   : > { %621 = vmax.xlane.f32.xlu1 %v620_v63  ;;  %v976_v63 = vld [vmem:[%s1497_s3 + $0x18] sm:$0xff] }
 0x2a8   : > { %808 = vmatpush.bf16.msrb.mxu2 %v976_v63 }
 0x2b3   : > { %v595_v0 = vpop.permute.xlu1 %594 }
 0x2b4   : > { %v610_v1 = vadd.f32 %v1376_v55, %v595_v0  ;;  %v975_v0 = vld [vmem:[%s1497_s3 + $0x10] sm:$0xff] }
 0x2b5   : > { %809 = vmatpush.bf16.msrb.mxu2 %v975_v0 }
 0x2b6   : > { %v623_v2 = vsel %vm613_vm9, %v610_v1, -inf }
 0x2c6   : > { %624 = vmax.xlane.f32.xlu0 %v623_v2  ;;  %v974_v2 = vld [vmem:[%s1497_s3 + $0x8] sm:$0xff] }
 0x2c7   : > { %810 = vmatpush.bf16.msrb.mxu2 %v974_v2 }
 0x309   : > { %v619_v3 = vpop.xlane.xlu2 %618 }
 0x30a   : > { %v627_v4 = vsub.f32 %v562_v57, %v619_v3  ;;  %v973_v3 = vld [vmem:[%s1497_s3] sm:$0xff] }
 0x30b   : > { %811 = vmatpush.bf16.msrb.mxu2 %v973_v3 }
 0x30c   : > { %v632_v5 = vmul.f32 1.442695, %v627_v4 }
 0x30e   : > { %v523_v6 = vpop.permute.xlu0 %522  ;;  %1045 = vpow2.f32 %v632_v5 }
 0x30f   : > { %v538_v7 = vadd.f32 %v1383_v13, %v523_v6 }
 0x311   : > { %v614_v8 = vsel %vm613_vm9, %v538_v7, -inf }
 0x312   : > { %615 = vmax.xlane.f32.xlu2 %v614_v8 }
 0x314   : > { %v1046_v58 = vpop.eup %1045 }
 0x315   : > { %v641_v9 = vsel %vm613_vm9, %v1046_v58, 0.0 }
 0x31a   : > { %642 = vadd.xlane.f32.xlu2 %v641_v9  ;;  %v622_v10 = vpop.xlane.xlu1 %621 }
 0x31b   : > { %v628_v11 = vsub.f32 %v586_v62, %v622_v10 }
 0x31d   : > { %v634_v55 = vmul.f32 1.442695, %v628_v11  ;;  %v1044_v11 = vld [vmem:[%s1498_s4] ss:$0 sm:$0xff] }
 0x31f   : > { %1047 = vpow2.f32 %v634_v55 }
 0x325   : > { %v1048_v12 = vpop.eup %1047 }
 0x326   : > { %v644_v14 = vsel %vm613_vm9, %v1048_v12, 0.0 }
 0x327   : > { %645 = vadd.xlane.f32.xlu1 %v644_v14 }
 0x332   : > { %313 = vrot.lane.b32.xlu2 %v1326_v47, %s1164_s11  ;;  %s1176_s11 = smov 48  }
 0x339   : > { %v625_v13 = vpop.xlane.xlu0 %624 }
 0x33a   : > { %v629_v15 = vsub.f32 %v610_v1, %v625_v13 }
 0x33c   : > { %v636_v16 = vmul.f32 1.442695, %v629_v15 }
 0x33e   : > { %1049 = vpow2.f32 %v636_v16 }
 0x340   : > { %315 = vrot.lane.b32.xlu1 %v1326_v47, %s1162_s9  ;;  %s1174_s9 = smov 16  }
 0x344   : > { %v1050_v17 = vpop.eup %1049 }
 0x345   : > { %v647_v18 = vsel %vm613_vm9, %v1050_v17, 0.0 }
 0x346   : > { %648 = vadd.xlane.f32.xlu0 %v647_v18 }
 0x35a   : > { %317 = vrot.lane.b32.xlu0 %v1326_v47, %s1163_s10  ;;  %s1175_s10 = smov 32  }
 0x385   : > { %v616_v19 = vpop.xlane.xlu2 %615 }
 0x386   : > { %v626_v20 = vsub.f32 %v538_v7, %v616_v19 }
 0x388   : > { %v630_v21 = vmul.f32 1.442695, %v626_v20 }
 0x38a   : > { %1051 = vpow2.f32 %v630_v21 }
 0x38d   : > { %v643_v22 = vpop.xlane.xlu2 %642 }
 0x38e   : > { %1053 = vrcp.f32 %v643_v22 }
 0x390   : > { %v1052_v23 = vpop.eup %1051 }
 0x391   : > { %v638_v24 = vsel %vm613_vm9, %v1052_v23, 0.0 }
 0x392   : > { %639 = vadd.xlane.f32.xlu2 %v638_v24 }
 0x394   : > { %v1054_v25 = vpop.eup %1053 }
 0x395   : > { %v655_v26 = vmul.f32 %v1054_v25, %v1046_v58  ;;  %v314_v27 = vpop.permute.xlu2 %313 }
 0x396   : > { %v685_v28 = vsel %vm497_vm2, %v314_v27, 0 }
 0x397   : > { %v659_v29 = vpack.c.bf16 %v655_v26, %v655_v26  ;;  %694 = vmatpush.bf16.msra.mxu3 %v685_v28 }
 0x39a   : > { %944 = vmatmul.msk.bf16.vlgmr.msra.gmra.mxu3 %vm613_vm9, %v659_v29  ;;  %v646_v47 = vpop.xlane.xlu1 %645 }
 0x39b   : > { %1055 = vrcp.f32 %v646_v47 }
 0x3a1   : > { %v1056_v30 = vpop.eup %1055 }
 0x3a2   : > { %v656_v31 = vmul.f32 %v1056_v30, %v1048_v12 }
 0x3a4   : > { %v660_v35 = vpack.c.bf16 %v656_v31, %v656_v31 }
 0x3b2   : > { %v316_v32 = vpop.permute.xlu1 %315 }
 0x3b3   : > { %v704_v33 = vsel %vm497_vm2, %v316_v32, 0 }
 0x3b4   : > { %713 = vmatpush.bf16.msrb.mxu0 %v704_v33 }
 0x3b7   : > { %945 = vmatmul.msk.bf16.vlgmr.msrb.gmra.mxu0 %vm613_vm9, %v660_v35 }
 0x3b9   : > { %v649_v36 = vpop.xlane.xlu0 %648 }
 0x3ba   : > { %1057 = vrcp.f32 %v649_v36 }
 0x3c0   : > { %v1058_v37 = vpop.eup %1057 }
 0x3c1   : > { %v657_v38 = vmul.f32 %v1058_v37, %v1050_v17 }
 0x3c3   : > { %v661_v41 = vpack.c.bf16 %v657_v38, %v657_v38 }
 0x3cc   : > { %v318_v39 = vpop.permute.xlu0 %317 }
 0x3cd   : > { %v723_v40 = vsel %vm497_vm2, %v318_v39, 0 }
 0x3ce   : > { %732 = vmatpush.bf16.msrb.mxu1 %v723_v40 }
 0x3d1   : > { %946 = vmatmul.msk.bf16.vlgmr.msrb.gmra.mxu1 %vm613_vm9, %v661_v41 }
 0x405   : > { %v640_v42 = vpop.xlane.xlu2 %639 }
 0x406   : > { %1059 = vrcp.f32 %v640_v42 }
 0x40c   : > { %v1060_v43 = vpop.eup %1059 }
 0x40d   : > { %v654_v44 = vmul.f32 %v1060_v43, %v1052_v23 }
 0x40f   : > { %v658_v45 = vpack.c.bf16 %v654_v44, %v654_v44 }
 0x411   : > { %943 = vmatmul.msk.bf16.vlgmr.msra.gmra.mxu2 %vm613_vm9, %v658_v45 }
 0x41d   : > { %v696_v46 = vpop.f32.mrf.mxu3 }
 0x41e   : > { %v739_v48 = vpack.c.bf16 %v696_v46, %v696_v46 }
 0x420   : > { %v743_v49 = vunpack.c.l.b16 %v739_v48 }
 0x422   : > { %v744_v50 = vpack.c.b16 %v743_v49, %v743_v49 }
 0x424   : > { %745 = vrot.lane.b32.xlu1 %v744_v50, %s1174_s9  ;;  %s829_s9 = scalar_lea.hbm %s1499_s5, %s965_s12 }
 0x425   : > { %v698_v51 = vpop.f32.mrf.mxu3  ;;  %s833_s23 = sshll.u32 %s829_s9, 4  ;;  %s834_s23 = int_to_ptr.hbm [resolvable:$true] %s833_s23 }
 0x426   : > { %s1105_s25 = sshra.s32 %s834_s23, 4  ;;  %s1106_s25 = int_to_ptr.hbm [resolvable:$true] %s1105_s25 }
 0x427   : > { %s1107_s26 = scalar_lea.hbm %s1106_s25, 8  ;;  %p1112_p3 = scmp.lt.s32.totalorder %s1106_s25, %s1499_s5 }
 0x428   : > { %p1108_p0 = scmp.ne.s32.totalorder %s1106_s25, %s1107_s26  ;;  %p1113_p4 = scmp.lt.s32.totalorder %s1111_s7, %s1107_s26 }
 0x42a   : > { %p1109_p1 = pnand %p1108_p0, %p1245_p5  ;;  %p1114_p7 = por %p1113_p4, %p1112_p3 }
 0x42c   : > { %p1110_p2 = pneg %p1109_p1 }
 0x42e   : > { %p1115_p8 = pnand %p1114_p7, %p1110_p2 }
 0x434   : > { %v715_v52 = vpop.f32.mrf.mxu0 }
 0x435   : > { %v740_v53 = vpack.c.bf16 %v715_v52, %v715_v52 }
 0x437   : > { %v748_v54 = vunpack.c.l.b16 %v740_v53 }
 0x439   : > { %v749_v56 = vpack.c.b16 %v748_v54, %v748_v54 }
 0x43b   : > { %750 = vrot.lane.b32.xlu0 %v749_v56, %s1175_s10 }
 0x43c   : > { %v717_v57 = vpop.f32.mrf.mxu0 }
 0x44e   : > { %v734_v59 = vpop.f32.mrf.mxu1 }
 0x44f   : > { %v741_v34 = vpack.c.bf16 %v734_v59, %v734_v59 }
 0x451   : > { %v753_v60 = vunpack.c.l.b16 %v741_v34 }
 0x453   : > { %v754_v61 = vpack.c.b16 %v753_v60, %v753_v60 }
 0x455   : > { %755 = vrot.lane.b32.xlu1 %v754_v61, %s1176_s11 }
 0x456   : > { %v736_v62 = vpop.f32.mrf.mxu1 }
 0x494   : > { %v677_v1 = vpop.f32.mrf.mxu2 }
 0x495   : > { %v738_v6 = vpack.c.bf16 %v677_v1, %v677_v1 }
 0x496   : > { %v746_v5 = vpop.permute.xlu1 %745 }
 0x497   : > { %v759_v8 = vsel %vm326_vm0, %v738_v6, %v746_v5 }
 0x49c   : > { %v679_v4 = vpop.f32.mrf.mxu2 }
 0x4ad   : > { %v751_v7 = vpop.permute.xlu0 %750 }
 0x4ae   : > { %v761_v58 = vsel %vm264_vm1, %v759_v8, %v751_v7 }
 0x4c7   : > { %v756_v9 = vpop.permute.xlu1 %755 }
 0x4c8   : > { %v764_v10 = vsel %vm762_vm10, %v761_v58, %v756_v9 }
 0x4c9   : > { %963 = vmatmul.msk.bf16.vlgmr.msrb.gmra.mxu2 %vm801_vm11, %v764_v10 }
 0x54c   : > { %v813_v55 = vpop.f32.mrf.mxu2 }
 0x54d   : > { %v814_v12 = vadd.f32 %v1044_v11, %v813_v55 }
 0x54f   : > { %817 = vst.msk [vmem:[%s232_s16] sm:$0xff] %vm264_vm1, %v814_v12 }
 0x550   : > { %1118 = shalt.err (!%p1115_p8)
}
 0x551   : > { %981 = dma.vmem_to_hbm [thread:$0]  (%p1245_p5), %s832_s17, 128, %s834_s23, %s819_s22  }
 0x554   : > { %v815_v14 = vpop.f32.mrf.mxu2 }
 0x555 PF: > { %p993_p9 = scmp.ge.s32.totalorder %s1157_s21, 2  ;;  %s845_s8 = sand.u32 1, %s1145_s18  }
 0x556   : > { %s846_s14 = scalar_lea.sflag [#allocation4], %s845_s8 }
 0x557   : > { %p988_p10 = pnand %p993_p9, %p1249_p6 }
 0x559   : > { %p989_p11 = pneg %p988_p10 }
 0x55b   : > { %1140 = dma.done.wait (%p989_p11), %s846_s14, 128  }
 0x55c   : > { %1142 = vsyncadd (%p989_p11), %s846_s14, 4294967168  ;;  %p16_p12 = scmp.ge.s32.totalorder %s1232_s24, 4   ;;  %s1502_s18 = smov %s1149_s19 }
 0x55d   : > { %s1503_s19 = smov %s1153_s20  ;;  %s1504_s20 = smov %s1243_s27 }
 0x55e   : > { %s1505_s21 = smov %s1232_s24  ;;  %18 = sbr.rel (!%p16_p12) target bundleno = 4 (0x4), region = 80 }
 0x563   :  { %852 = vsyncpa [#allocation3], 1 }
 0x564   :  { %854 = vsyncpa [#allocation3 + $0x1], 1 }
 0x565   :  { %855 = vsyncpa [#allocation4], 1 }
 0x566   :  { %857 = vsyncpa [#allocation4 + $0x1], 1 }

</bundles_post_ra>
